<compile_context>
chip_gen: v5e
topology: v5e:2x2
jax: 0.10.0
libtpu: 0.0.40
codegen_flags: <defaults>
</compile_context>

<pallas_src>
import math
import functools

import numpy as np
import jax
import jax.numpy as jnp
from jax.experimental import pallas as pl
from jax.experimental.pallas import tpu as pltpu


# ----------------------------- Pallas kernel -------------------------------------

def _layer_norm(x, gamma, beta, eps=1e-5):
    # f32 math; gamma/beta are (1, d_model) rows.
    mean = jnp.mean(x, axis=-1, keepdims=True)
    var = jnp.mean((x - mean) ** 2, axis=-1, keepdims=True)
    return (x - mean) * jax.lax.rsqrt(var + eps) * gamma + beta


def refine_textual_kernel(
    t_ref, v_ref,
    wq_ref, bq_ref, wkv_ref, bkv_ref,
    wfc_ref, bfc_ref, g1_ref, be1_ref,
    w1_ref, b1_ref, w2_ref, b2_ref, g2_ref, be2_ref,
    o_ref,
    *, n_head, d_k, d_v,
):
    T = t_ref[0]   # (Lt, d_model) f32 — query / residual path
    V = v_ref[0]   # (Lv, d_model) f32 — key / value source
    Lt = T.shape[0]
    Lv = V.shape[0]

    T_bf = T.astype(jnp.bfloat16)
    V_bf = V.astype(jnp.bfloat16)

    # --- projections: Q from T; K|V fused into one matmul (same input V) ---
    q = jnp.dot(T_bf, wq_ref[...], preferred_element_type=jnp.float32) + bq_ref[...]
    kv = jnp.dot(V_bf, wkv_ref[...], preferred_element_type=jnp.float32) + bkv_ref[...]
    k = kv[:, : n_head * d_k]
    v = kv[:, n_head * d_k:]

    # --- move heads to a batch dim once (single relayout, not per-head slicing) ---
    qh = jnp.transpose(q.reshape(Lt, n_head, d_k), (1, 0, 2)).astype(jnp.bfloat16)
    kh = jnp.transpose(k.reshape(Lv, n_head, d_k), (1, 0, 2)).astype(jnp.bfloat16)
    vh = jnp.transpose(v.reshape(Lv, n_head, d_v), (1, 0, 2)).astype(jnp.bfloat16)

    # --- batched scaled dot-product attention over all heads at once ---
    s = jnp.einsum('hqd,hkd->hqk', qh, kh,
                   preferred_element_type=jnp.float32) * (1.0 / math.sqrt(d_k))
    s = s - jnp.max(s, axis=-1, keepdims=True)
    p = jnp.exp(s)                                                   # f32
    p = p * pl.reciprocal(jnp.sum(p, axis=-1, keepdims=True), approx=True)
    oh = jnp.einsum('hqk,hkd->hqd', p.astype(jnp.bfloat16), vh,
                    preferred_element_type=jnp.float32)              # (n_head, Lt, d_v)
    concat = jnp.transpose(oh, (1, 0, 2)).reshape(Lt, n_head * d_v)  # (Lt, n_head*d_v)

    # --- output projection + residual + LayerNorm ---
    attn_out = jnp.dot(concat.astype(jnp.bfloat16), wfc_ref[...],
                       preferred_element_type=jnp.float32) + bfc_ref[...]
    x = _layer_norm(attn_out + T, g1_ref[...], be1_ref[...])

    # --- position-wise FFN (Conv1d k=1 == Linear) + residual + LayerNorm ---
    h1 = jnp.maximum(
        jnp.dot(x.astype(jnp.bfloat16), w1_ref[...],
                preferred_element_type=jnp.float32) + b1_ref[...], 0.0)
    y = jnp.dot(h1.astype(jnp.bfloat16), w2_ref[...],
                preferred_element_type=jnp.float32) + b2_ref[...]
    out = _layer_norm(y + x, g2_ref[...], be2_ref[...])

    o_ref[0] = out.astype(o_ref.dtype)


def refine_textual_layer(V, T, params, *, n_head, d_k, d_v):
    """V: (B, Lv, d_model), T: (B, Lt, d_model) -> (B, Lt, d_model)."""
    B, Lt, d_model = T.shape
    _, Lv, _ = V.shape

    bf16 = jnp.bfloat16

    def row(b):  # 1-D params -> (1, n) rows (cheap sublane broadcast in-kernel)
        return b.reshape(1, -1).astype(jnp.float32)

    # Fuse K and V projection weights (same input V) into one matmul.
    wkv = jnp.concatenate([params["wk"], params["wv"]], axis=1).astype(bf16)
    bkv = jnp.concatenate([params["bk"], params["bv"]], axis=0).reshape(1, -1)

    # MXU-operand weights in bf16; biases / LayerNorm params stay f32.
    weights = [
        params["wq"].astype(bf16), row(params["bq"]),
        wkv, bkv.astype(jnp.float32),
        params["wfc"].astype(bf16), row(params["bfc"]),
        row(params["ln1_g"]), row(params["ln1_b"]),
        params["w1"].astype(bf16), row(params["b1"]),
        params["w2"].astype(bf16), row(params["b2"]),
        row(params["ln2_g"]), row(params["ln2_b"]),
    ]

    kernel = functools.partial(refine_textual_kernel, n_head=n_head, d_k=d_k, d_v=d_v)

    # Whole-array (untiled) weight blocks; same block at every grid step. At these
    # sizes default double-buffering of weights is negligible; for large weights use
    # pipeline_mode=pl.Buffered(1) or a resident VMEM scratch.
    weight_specs = [pl.BlockSpec(w.shape, lambda b: (0, 0)) for w in weights]

    return pl.pallas_call(
        kernel,
        out_shape=jax.ShapeDtypeStruct((B, Lt, d_model), jnp.float32),
        grid_spec=pltpu.PrefetchScalarGridSpec(
            num_scalar_prefetch=0,
            grid=(B,),
            in_specs=[
                pl.BlockSpec((1, Lt, d_model), lambda b: (b, 0, 0)),   # T
                pl.BlockSpec((1, Lv, d_model), lambda b: (b, 0, 0)),   # V
            ] + weight_specs,
            out_specs=pl.BlockSpec((1, Lt, d_model), lambda b: (b, 0, 0)),
        ),
        compiler_params=pltpu.CompilerParams(dimension_semantics=("parallel",)),
    )(T, V, *weights)


# ----------------------------- reference (plain JAX, f32) -------------------------

def reference(V, T, p, *, n_head, d_k, d_v):
    def one(Tb, Vb):
        q = Tb @ p["wq"] + p["bq"]
        k = Vb @ p["wk"] + p["bk"]
        v = Vb @ p["wv"] + p["bv"]
        temp = 1.0 / math.sqrt(d_k)
        heads = []
        for h in range(n_head):
            qh = q[:, h * d_k:(h + 1) * d_k]
            kh = k[:, h * d_k:(h + 1) * d_k]
            vh = v[:, h * d_v:(h + 1) * d_v]
            s = qh @ kh.T * temp
            s = s - s.max(-1, keepdims=True)
            pr = jnp.exp(s)
            pr = pr / pr.sum(-1, keepdims=True)
            heads.append(pr @ vh)
        concat = jnp.concatenate(heads, axis=-1)
        x = _layer_norm(concat @ p["wfc"] + p["bfc"] + Tb, p["ln1_g"], p["ln1_b"])
        h1 = jnp.maximum(x @ p["w1"] + p["b1"], 0.0)
        y = h1 @ p["w2"] + p["b2"]
        return _layer_norm(y + x, p["ln2_g"], p["ln2_b"])

    return jax.vmap(one)(T, V)


# ----------------------------- main -----------------------------------------------

if __name__ == "__main__":
    # Small, module-consistent shapes.
    B, Lv, Lt = 2, 8, 8
    d_model, d_inner, n_head, d_k, d_v = 32, 64, 4, 8, 8

    key = jax.random.PRNGKey(0)
    ks = jax.random.split(key, 12)

    def init(k, shape, scale):
        return jax.random.normal(k, shape, jnp.float32) * scale

    # Weights stored in (in_features, out_features) orientation (x @ W + b).
    params = {
        "wq": init(ks[0], (d_model, n_head * d_k), math.sqrt(2.0 / (d_model + d_k))),
        "bq": jnp.zeros((n_head * d_k,), jnp.float32),
        "wk": init(ks[1], (d_model, n_head * d_k), math.sqrt(2.0 / (d_model + d_k))),
        "bk": jnp.zeros((n_head * d_k,), jnp.float32),
        "wv": init(ks[2], (d_model, n_head * d_v), math.sqrt(2.0 / (d_model + d_v))),
        "bv": jnp.zeros((n_head * d_v,), jnp.float32),
        "wfc": init(ks[3], (n_head * d_v, d_model), 1.0 / math.sqrt(n_head * d_v)),
        "bfc": init(ks[4], (d_model,), 0.02),
        "ln1_g": jnp.ones((d_model,), jnp.float32),
        "ln1_b": jnp.zeros((d_model,), jnp.float32),
        "w1": init(ks[5], (d_model, d_inner), 1.0 / math.sqrt(d_model)),   # Conv1d(d_model, d_inner, 1)
        "b1": init(ks[6], (d_inner,), 0.02),
        "w2": init(ks[7], (d_inner, d_model), 1.0 / math.sqrt(d_inner)),   # Conv1d(d_inner, d_model, 1)
        "b2": init(ks[8], (d_model,), 0.02),
        "ln2_g": jnp.ones((d_model,), jnp.float32),
        "ln2_b": jnp.zeros((d_model,), jnp.float32),
    }

    V = jax.random.normal(ks[9], (B, Lv, d_model), jnp.float32)   # visual features
    T = jax.random.normal(ks[10], (B, Lt, d_model), jnp.float32)  # textual features

    out = refine_textual_layer(V, T, params, n_head=n_head, d_k=d_k, d_v=d_v)
    out = jax.block_until_ready(out)

    ref = jax.block_until_ready(reference(V, T, params, n_head=n_head, d_k=d_k, d_v=d_v))
    # bf16 MXU operands -> loosened tolerance vs the f32 reference.
    np.testing.assert_allclose(np.asarray(out), np.asarray(ref), rtol=2e-2, atol=2e-2)

    print("KERNEL_OK")
</pallas_src>

<mosaic_0001>
module attributes {stable_mosaic.version = 11 : i64} {
  func.func @refine_textual_kernel(%arg0: i32, %arg1: memref<1x8x32xf32, #tpu.memory_space<vmem>>, %arg2: memref<1x8x32xf32, #tpu.memory_space<vmem>>, %arg3: memref<32x32xbf16, #tpu.memory_space<vmem>>, %arg4: memref<1x32xf32, #tpu.memory_space<vmem>>, %arg5: memref<32x64xbf16, #tpu.memory_space<vmem>>, %arg6: memref<1x64xf32, #tpu.memory_space<vmem>>, %arg7: memref<32x32xbf16, #tpu.memory_space<vmem>>, %arg8: memref<1x32xf32, #tpu.memory_space<vmem>>, %arg9: memref<1x32xf32, #tpu.memory_space<vmem>>, %arg10: memref<1x32xf32, #tpu.memory_space<vmem>>, %arg11: memref<32x64xbf16, #tpu.memory_space<vmem>>, %arg12: memref<1x64xf32, #tpu.memory_space<vmem>>, %arg13: memref<64x32xbf16, #tpu.memory_space<vmem>>, %arg14: memref<1x32xf32, #tpu.memory_space<vmem>>, %arg15: memref<1x32xf32, #tpu.memory_space<vmem>>, %arg16: memref<1x32xf32, #tpu.memory_space<vmem>>, %arg17: memref<1x8x32xf32, #tpu.memory_space<vmem>>) attributes {dimension_semantics = [#tpu.dimension_semantics<parallel>], iteration_bounds = array<i64: 2>, scalar_prefetch = 0 : i64, scratch_operands = 0 : i64, tpu.core_type = #tpu.core_type<tc>, window_params = [{transform_indices = @transform_0, window_bounds = array<i64: 1, 8, 32>}, {transform_indices = @transform_1, window_bounds = array<i64: 1, 8, 32>}, {pipeline_mode = #tpu.pipeline_mode<synchronous>, transform_indices = @transform_2, window_bounds = array<i64: 32, 32>}, {pipeline_mode = #tpu.pipeline_mode<synchronous>, transform_indices = @transform_3, window_bounds = array<i64: 1, 32>}, {pipeline_mode = #tpu.pipeline_mode<synchronous>, transform_indices = @transform_4, window_bounds = array<i64: 32, 64>}, {pipeline_mode = #tpu.pipeline_mode<synchronous>, transform_indices = @transform_5, window_bounds = array<i64: 1, 64>}, {pipeline_mode = #tpu.pipeline_mode<synchronous>, transform_indices = @transform_6, window_bounds = array<i64: 32, 32>}, {pipeline_mode = #tpu.pipeline_mode<synchronous>, transform_indices = @transform_7, window_bounds = array<i64: 1, 32>}, {pipeline_mode = #tpu.pipeline_mode<synchronous>, transform_indices = @transform_8, window_bounds = array<i64: 1, 32>}, {pipeline_mode = #tpu.pipeline_mode<synchronous>, transform_indices = @transform_9, window_bounds = array<i64: 1, 32>}, {pipeline_mode = #tpu.pipeline_mode<synchronous>, transform_indices = @transform_10, window_bounds = array<i64: 32, 64>}, {pipeline_mode = #tpu.pipeline_mode<synchronous>, transform_indices = @transform_11, window_bounds = array<i64: 1, 64>}, {pipeline_mode = #tpu.pipeline_mode<synchronous>, transform_indices = @transform_12, window_bounds = array<i64: 64, 32>}, {pipeline_mode = #tpu.pipeline_mode<synchronous>, transform_indices = @transform_13, window_bounds = array<i64: 1, 32>}, {pipeline_mode = #tpu.pipeline_mode<synchronous>, transform_indices = @transform_14, window_bounds = array<i64: 1, 32>}, {pipeline_mode = #tpu.pipeline_mode<synchronous>, transform_indices = @transform_15, window_bounds = array<i64: 1, 32>}, {transform_indices = @transform_16, window_bounds = array<i64: 1, 8, 32>}]} {
    %c0 = arith.constant 0 : index
    %c0_0 = arith.constant 0 : index
    %c0_1 = arith.constant 0 : index
    %0 = vector.load %arg1[%c0, %c0_0, %c0_1] : memref<1x8x32xf32, #tpu.memory_space<vmem>>, vector<1x8x32xf32>
    %1 = vector.shape_cast %0 : vector<1x8x32xf32> to vector<8x32xf32>
    %c0_2 = arith.constant 0 : index
    %c0_3 = arith.constant 0 : index
    %c0_4 = arith.constant 0 : index
    %2 = vector.load %arg2[%c0_2, %c0_3, %c0_4] : memref<1x8x32xf32, #tpu.memory_space<vmem>>, vector<1x8x32xf32>
    %3 = vector.shape_cast %2 : vector<1x8x32xf32> to vector<8x32xf32>
    %4 = arith.truncf %1 : vector<8x32xf32> to vector<8x32xbf16>
    %5 = arith.truncf %3 : vector<8x32xf32> to vector<8x32xbf16>
    %c0_5 = arith.constant 0 : index
    %c0_6 = arith.constant 0 : index
    %6 = vector.load %arg3[%c0_5, %c0_6] : memref<32x32xbf16, #tpu.memory_space<vmem>>, vector<32x32xbf16>
    %cst = arith.constant dense<0.000000e+00> : vector<8x32xf32>
    %7 = tpu.matmul %4, %6, %cst {dimension_numbers = #tpu.dot_dimension_numbers<[1], [0], [0], [1], [0, 0, 1, 1], [], []>} : vector<8x32xbf16>, vector<32x32xbf16>, vector<8x32xf32> -> vector<8x32xf32>
    %c0_7 = arith.constant 0 : index
    %c0_8 = arith.constant 0 : index
    %8 = vector.load %arg4[%c0_7, %c0_8] : memref<1x32xf32, #tpu.memory_space<vmem>>, vector<1x32xf32>
    %9 = vector.broadcast %8 : vector<1x32xf32> to vector<8x32xf32>
    %10 = arith.addf %7, %9 : vector<8x32xf32>
    %c0_9 = arith.constant 0 : index
    %c0_10 = arith.constant 0 : index
    %11 = vector.load %arg5[%c0_9, %c0_10] : memref<32x64xbf16, #tpu.memory_space<vmem>>, vector<32x64xbf16>
    %cst_11 = arith.constant dense<0.000000e+00> : vector<8x64xf32>
    %12 = tpu.matmul %5, %11, %cst_11 {dimension_numbers = #tpu.dot_dimension_numbers<[1], [0], [0], [1], [0, 0, 1, 1], [], []>} : vector<8x32xbf16>, vector<32x64xbf16>, vector<8x64xf32> -> vector<8x64xf32>
    %c0_12 = arith.constant 0 : index
    %c0_13 = arith.constant 0 : index
    %13 = vector.load %arg6[%c0_12, %c0_13] : memref<1x64xf32, #tpu.memory_space<vmem>>, vector<1x64xf32>
    %14 = vector.broadcast %13 : vector<1x64xf32> to vector<8x64xf32>
    %15 = arith.addf %12, %14 : vector<8x64xf32>
    %16 = vector.extract_strided_slice %15 {offsets = [0, 0], sizes = [8, 32], strides = [1, 1]} : vector<8x64xf32> to vector<8x32xf32>
    %17 = vector.extract_strided_slice %15 {offsets = [0, 32], sizes = [8, 32], strides = [1, 1]} : vector<8x64xf32> to vector<8x32xf32>
    %18 = vector.shape_cast %10 : vector<8x32xf32> to vector<8x4x8xf32>
    %19 = tpu.transpose %18, [1, 0, 2] : vector<8x4x8xf32> -> vector<4x8x8xf32>
    %20 = arith.truncf %19 : vector<4x8x8xf32> to vector<4x8x8xbf16>
    %21 = vector.shape_cast %16 : vector<8x32xf32> to vector<8x4x8xf32>
    %22 = tpu.transpose %21, [1, 0, 2] : vector<8x4x8xf32> -> vector<4x8x8xf32>
    %23 = arith.truncf %22 : vector<4x8x8xf32> to vector<4x8x8xbf16>
    %24 = vector.shape_cast %17 : vector<8x32xf32> to vector<8x4x8xf32>
    %25 = tpu.transpose %24, [1, 0, 2] : vector<8x4x8xf32> -> vector<4x8x8xf32>
    %26 = arith.truncf %25 : vector<4x8x8xf32> to vector<4x8x8xbf16>
    "tpu.trace_start"() <{level = 10 : i32, message = "hqd,hkd->hqk"}> : () -> ()
    %cst_14 = arith.constant dense<0.000000e+00> : vector<4x8x8xf32>
    %27 = tpu.matmul %20, %23, %cst_14 {dimension_numbers = #tpu.dot_dimension_numbers<[2], [2], [1], [1], [0, 0, 0, 1, 1, 1], [0], [0]>} : vector<4x8x8xbf16>, vector<4x8x8xbf16>, vector<4x8x8xf32> -> vector<4x8x8xf32>
    "tpu.trace_stop"() : () -> ()
    %cst_15 = arith.constant 0.353553385 : f32
    %28 = vector.broadcast %cst_15 : f32 to vector<4x8x8xf32>
    %29 = arith.mulf %27, %28 : vector<4x8x8xf32>
    %cst_16 = arith.constant dense<0xFF800000> : vector<4x8xf32>
    %30 = vector.multi_reduction <maximumf>, %29, %cst_16 [2] : vector<4x8x8xf32> to vector<4x8xf32>
    %31 = vector.shape_cast %30 : vector<4x8xf32> to vector<4x8x1xf32>
    %32 = vector.broadcast %31 : vector<4x8x1xf32> to vector<4x8x8xf32>
    %33 = arith.subf %29, %32 : vector<4x8x8xf32>
    %34 = math.exp %33 : vector<4x8x8xf32>
    %cst_17 = arith.constant dense<0.000000e+00> : vector<4x8xf32>
    %35 = vector.multi_reduction <add>, %34, %cst_17 [2] : vector<4x8x8xf32> to vector<4x8xf32>
    %36 = vector.shape_cast %35 : vector<4x8xf32> to vector<4x8x1xf32>
    %37 = tpu.reciprocal %36 {approx = true} : vector<4x8x1xf32> -> vector<4x8x1xf32>
    %38 = vector.broadcast %37 : vector<4x8x1xf32> to vector<4x8x8xf32>
    %39 = arith.mulf %34, %38 : vector<4x8x8xf32>
    %40 = arith.truncf %39 : vector<4x8x8xf32> to vector<4x8x8xbf16>
    "tpu.trace_start"() <{level = 10 : i32, message = "hqk,hkd->hqd"}> : () -> ()
    %cst_18 = arith.constant dense<0.000000e+00> : vector<4x8x8xf32>
    %41 = tpu.matmul %40, %26, %cst_18 {dimension_numbers = #tpu.dot_dimension_numbers<[2], [1], [1], [2], [0, 0, 0, 1, 1, 2], [0], [0]>} : vector<4x8x8xbf16>, vector<4x8x8xbf16>, vector<4x8x8xf32> -> vector<4x8x8xf32>
    "tpu.trace_stop"() : () -> ()
    %42 = tpu.transpose %41, [1, 0, 2] : vector<4x8x8xf32> -> vector<8x4x8xf32>
    %43 = vector.shape_cast %42 : vector<8x4x8xf32> to vector<8x32xf32>
    %44 = arith.truncf %43 : vector<8x32xf32> to vector<8x32xbf16>
    %c0_19 = arith.constant 0 : index
    %c0_20 = arith.constant 0 : index
    %45 = vector.load %arg7[%c0_19, %c0_20] : memref<32x32xbf16, #tpu.memory_space<vmem>>, vector<32x32xbf16>
    %cst_21 = arith.constant dense<0.000000e+00> : vector<8x32xf32>
    %46 = tpu.matmul %44, %45, %cst_21 {dimension_numbers = #tpu.dot_dimension_numbers<[1], [0], [0], [1], [0, 0, 1, 1], [], []>} : vector<8x32xbf16>, vector<32x32xbf16>, vector<8x32xf32> -> vector<8x32xf32>
    %c0_22 = arith.constant 0 : index
    %c0_23 = arith.constant 0 : index
    %47 = vector.load %arg8[%c0_22, %c0_23] : memref<1x32xf32, #tpu.memory_space<vmem>>, vector<1x32xf32>
    %48 = vector.broadcast %47 : vector<1x32xf32> to vector<8x32xf32>
    %49 = arith.addf %46, %48 : vector<8x32xf32>
    %50 = arith.addf %49, %1 : vector<8x32xf32>
    %c0_24 = arith.constant 0 : index
    %c0_25 = arith.constant 0 : index
    %51 = vector.load %arg9[%c0_24, %c0_25] : memref<1x32xf32, #tpu.memory_space<vmem>>, vector<1x32xf32>
    %c0_26 = arith.constant 0 : index
    %c0_27 = arith.constant 0 : index
    %52 = vector.load %arg10[%c0_26, %c0_27] : memref<1x32xf32, #tpu.memory_space<vmem>>, vector<1x32xf32>
    %cst_28 = arith.constant dense<0.000000e+00> : vector<8xf32>
    %53 = vector.multi_reduction <add>, %50, %cst_28 [1] : vector<8x32xf32> to vector<8xf32>
    %54 = vector.shape_cast %53 : vector<8xf32> to vector<8x1xf32>
    %cst_29 = arith.constant 3.200000e+01 : f32
    %55 = vector.broadcast %cst_29 : f32 to vector<8x1xf32>
    %56 = arith.divf %54, %55 : vector<8x1xf32>
    %57 = vector.broadcast %56 : vector<8x1xf32> to vector<8x32xf32>
    %58 = arith.subf %50, %57 : vector<8x32xf32>
    %59 = arith.mulf %58, %58 : vector<8x32xf32>
    %cst_30 = arith.constant dense<0.000000e+00> : vector<8xf32>
    %60 = vector.multi_reduction <add>, %59, %cst_30 [1] : vector<8x32xf32> to vector<8xf32>
    %61 = vector.shape_cast %60 : vector<8xf32> to vector<8x1xf32>
    %cst_31 = arith.constant 3.200000e+01 : f32
    %62 = vector.broadcast %cst_31 : f32 to vector<8x1xf32>
    %63 = arith.divf %61, %62 : vector<8x1xf32>
    %64 = vector.broadcast %56 : vector<8x1xf32> to vector<8x32xf32>
    %65 = arith.subf %50, %64 : vector<8x32xf32>
    %cst_32 = arith.constant 9.99999974E-6 : f32
    %66 = vector.broadcast %cst_32 : f32 to vector<8x1xf32>
    %67 = arith.addf %63, %66 : vector<8x1xf32>
    %68 = math.rsqrt %67 : vector<8x1xf32>
    %69 = vector.broadcast %68 : vector<8x1xf32> to vector<8x32xf32>
    %70 = arith.mulf %65, %69 : vector<8x32xf32>
    %71 = vector.broadcast %51 : vector<1x32xf32> to vector<8x32xf32>
    %72 = arith.mulf %70, %71 : vector<8x32xf32>
    %73 = vector.broadcast %52 : vector<1x32xf32> to vector<8x32xf32>
    %74 = arith.addf %72, %73 : vector<8x32xf32>
    %75 = arith.truncf %74 : vector<8x32xf32> to vector<8x32xbf16>
    %c0_33 = arith.constant 0 : index
    %c0_34 = arith.constant 0 : index
    %76 = vector.load %arg11[%c0_33, %c0_34] : memref<32x64xbf16, #tpu.memory_space<vmem>>, vector<32x64xbf16>
    %cst_35 = arith.constant dense<0.000000e+00> : vector<8x64xf32>
    %77 = tpu.matmul %75, %76, %cst_35 {dimension_numbers = #tpu.dot_dimension_numbers<[1], [0], [0], [1], [0, 0, 1, 1], [], []>} : vector<8x32xbf16>, vector<32x64xbf16>, vector<8x64xf32> -> vector<8x64xf32>
    %c0_36 = arith.constant 0 : index
    %c0_37 = arith.constant 0 : index
    %78 = vector.load %arg12[%c0_36, %c0_37] : memref<1x64xf32, #tpu.memory_space<vmem>>, vector<1x64xf32>
    %79 = vector.broadcast %78 : vector<1x64xf32> to vector<8x64xf32>
    %80 = arith.addf %77, %79 : vector<8x64xf32>
    %cst_38 = arith.constant 0.000000e+00 : f32
    %81 = vector.broadcast %cst_38 : f32 to vector<8x64xf32>
    %82 = arith.maximumf %80, %81 : vector<8x64xf32>
    %83 = arith.truncf %82 : vector<8x64xf32> to vector<8x64xbf16>
    %c0_39 = arith.constant 0 : index
    %c0_40 = arith.constant 0 : index
    %84 = vector.load %arg13[%c0_39, %c0_40] : memref<64x32xbf16, #tpu.memory_space<vmem>>, vector<64x32xbf16>
    %cst_41 = arith.constant dense<0.000000e+00> : vector<8x32xf32>
    %85 = tpu.matmul %83, %84, %cst_41 {dimension_numbers = #tpu.dot_dimension_numbers<[1], [0], [0], [1], [0, 0, 1, 1], [], []>} : vector<8x64xbf16>, vector<64x32xbf16>, vector<8x32xf32> -> vector<8x32xf32>
    %c0_42 = arith.constant 0 : index
    %c0_43 = arith.constant 0 : index
    %86 = vector.load %arg14[%c0_42, %c0_43] : memref<1x32xf32, #tpu.memory_space<vmem>>, vector<1x32xf32>
    %87 = vector.broadcast %86 : vector<1x32xf32> to vector<8x32xf32>
    %88 = arith.addf %85, %87 : vector<8x32xf32>
    %89 = arith.addf %88, %74 : vector<8x32xf32>
    %c0_44 = arith.constant 0 : index
    %c0_45 = arith.constant 0 : index
    %90 = vector.load %arg15[%c0_44, %c0_45] : memref<1x32xf32, #tpu.memory_space<vmem>>, vector<1x32xf32>
    %c0_46 = arith.constant 0 : index
    %c0_47 = arith.constant 0 : index
    %91 = vector.load %arg16[%c0_46, %c0_47] : memref<1x32xf32, #tpu.memory_space<vmem>>, vector<1x32xf32>
    %cst_48 = arith.constant dense<0.000000e+00> : vector<8xf32>
    %92 = vector.multi_reduction <add>, %89, %cst_48 [1] : vector<8x32xf32> to vector<8xf32>
    %93 = vector.shape_cast %92 : vector<8xf32> to vector<8x1xf32>
    %cst_49 = arith.constant 3.200000e+01 : f32
    %94 = vector.broadcast %cst_49 : f32 to vector<8x1xf32>
    %95 = arith.divf %93, %94 : vector<8x1xf32>
    %96 = vector.broadcast %95 : vector<8x1xf32> to vector<8x32xf32>
    %97 = arith.subf %89, %96 : vector<8x32xf32>
    %98 = arith.mulf %97, %97 : vector<8x32xf32>
    %cst_50 = arith.constant dense<0.000000e+00> : vector<8xf32>
    %99 = vector.multi_reduction <add>, %98, %cst_50 [1] : vector<8x32xf32> to vector<8xf32>
    %100 = vector.shape_cast %99 : vector<8xf32> to vector<8x1xf32>
    %cst_51 = arith.constant 3.200000e+01 : f32
    %101 = vector.broadcast %cst_51 : f32 to vector<8x1xf32>
    %102 = arith.divf %100, %101 : vector<8x1xf32>
    %103 = vector.broadcast %95 : vector<8x1xf32> to vector<8x32xf32>
    %104 = arith.subf %89, %103 : vector<8x32xf32>
    %cst_52 = arith.constant 9.99999974E-6 : f32
    %105 = vector.broadcast %cst_52 : f32 to vector<8x1xf32>
    %106 = arith.addf %102, %105 : vector<8x1xf32>
    %107 = math.rsqrt %106 : vector<8x1xf32>
    %108 = vector.broadcast %107 : vector<8x1xf32> to vector<8x32xf32>
    %109 = arith.mulf %104, %108 : vector<8x32xf32>
    %110 = vector.broadcast %90 : vector<1x32xf32> to vector<8x32xf32>
    %111 = arith.mulf %109, %110 : vector<8x32xf32>
    %112 = vector.broadcast %91 : vector<1x32xf32> to vector<8x32xf32>
    %113 = arith.addf %111, %112 : vector<8x32xf32>
    %c0_53 = arith.constant 0 : index
    %c0_54 = arith.constant 0 : index
    %c0_55 = arith.constant 0 : index
    %114 = vector.load %arg17[%c0_53, %c0_54, %c0_55] : memref<1x8x32xf32, #tpu.memory_space<vmem>>, vector<1x8x32xf32>
    %115 = vector.shape_cast %114 : vector<1x8x32xf32> to vector<8x32xf32>
    %116 = vector.shape_cast %113 : vector<8x32xf32> to vector<1x8x32xf32>
    tpu.vector_store %arg17[%c0_53, %c0_54, %c0_55], %116 {strides = array<i32>} : memref<1x8x32xf32, #tpu.memory_space<vmem>>, vector<1x8x32xf32>,
    return
  }
  func.func @transform_0(%arg0: i32) -> (i32, i32, i32) {
    %c0_i32 = arith.constant 0 : i32
    %c0_i32_0 = arith.constant 0 : i32
    %c0_i32_1 = arith.constant 0 : i32
    return %arg0, %c0_i32, %c0_i32_0 : i32, i32, i32
  }
  func.func @transform_1(%arg0: i32) -> (i32, i32, i32) {
    %c0_i32 = arith.constant 0 : i32
    %c0_i32_0 = arith.constant 0 : i32
    %c0_i32_1 = arith.constant 0 : i32
    return %arg0, %c0_i32, %c0_i32_0 : i32, i32, i32
  }
  func.func @transform_2(%arg0: i32) -> (i32, i32) {
    %c0_i32 = arith.constant 0 : i32
    %c0_i32_0 = arith.constant 0 : i32
    %c0_i32_1 = arith.constant 0 : i32
    return %c0_i32, %c0_i32_0 : i32, i32
  }
  func.func @transform_3(%arg0: i32) -> (i32, i32) {
    %c0_i32 = arith.constant 0 : i32
    %c0_i32_0 = arith.constant 0 : i32
    %c0_i32_1 = arith.constant 0 : i32
    return %c0_i32, %c0_i32_0 : i32, i32
  }
  func.func @transform_4(%arg0: i32) -> (i32, i32) {
    %c0_i32 = arith.constant 0 : i32
    %c0_i32_0 = arith.constant 0 : i32
    %c0_i32_1 = arith.constant 0 : i32
    return %c0_i32, %c0_i32_0 : i32, i32
  }
  func.func @transform_5(%arg0: i32) -> (i32, i32) {
    %c0_i32 = arith.constant 0 : i32
    %c0_i32_0 = arith.constant 0 : i32
    %c0_i32_1 = arith.constant 0 : i32
    return %c0_i32, %c0_i32_0 : i32, i32
  }
  func.func @transform_6(%arg0: i32) -> (i32, i32) {
    %c0_i32 = arith.constant 0 : i32
    %c0_i32_0 = arith.constant 0 : i32
    %c0_i32_1 = arith.constant 0 : i32
    return %c0_i32, %c0_i32_0 : i32, i32
  }
  func.func @transform_7(%arg0: i32) -> (i32, i32) {
    %c0_i32 = arith.constant 0 : i32
    %c0_i32_0 = arith.constant 0 : i32
    %c0_i32_1 = arith.constant 0 : i32
    return %c0_i32, %c0_i32_0 : i32, i32
  }
  func.func @transform_8(%arg0: i32) -> (i32, i32) {
    %c0_i32 = arith.constant 0 : i32
    %c0_i32_0 = arith.constant 0 : i32
    %c0_i32_1 = arith.constant 0 : i32
    return %c0_i32, %c0_i32_0 : i32, i32
  }
  func.func @transform_9(%arg0: i32) -> (i32, i32) {
    %c0_i32 = arith.constant 0 : i32
    %c0_i32_0 = arith.constant 0 : i32
    %c0_i32_1 = arith.constant 0 : i32
    return %c0_i32, %c0_i32_0 : i32, i32
  }
  func.func @transform_10(%arg0: i32) -> (i32, i32) {
    %c0_i32 = arith.constant 0 : i32
    %c0_i32_0 = arith.constant 0 : i32
    %c0_i32_1 = arith.constant 0 : i32
    return %c0_i32, %c0_i32_0 : i32, i32
  }
  func.func @transform_11(%arg0: i32) -> (i32, i32) {
    %c0_i32 = arith.constant 0 : i32
    %c0_i32_0 = arith.constant 0 : i32
    %c0_i32_1 = arith.constant 0 : i32
    return %c0_i32, %c0_i32_0 : i32, i32
  }
  func.func @transform_12(%arg0: i32) -> (i32, i32) {
    %c0_i32 = arith.constant 0 : i32
    %c0_i32_0 = arith.constant 0 : i32
    %c0_i32_1 = arith.constant 0 : i32
    return %c0_i32, %c0_i32_0 : i32, i32
  }
  func.func @transform_13(%arg0: i32) -> (i32, i32) {
    %c0_i32 = arith.constant 0 : i32
    %c0_i32_0 = arith.constant 0 : i32
    %c0_i32_1 = arith.constant 0 : i32
    return %c0_i32, %c0_i32_0 : i32, i32
  }
  func.func @transform_14(%arg0: i32) -> (i32, i32) {
    %c0_i32 = arith.constant 0 : i32
    %c0_i32_0 = arith.constant 0 : i32
    %c0_i32_1 = arith.constant 0 : i32
    return %c0_i32, %c0_i32_0 : i32, i32
  }
  func.func @transform_15(%arg0: i32) -> (i32, i32) {
    %c0_i32 = arith.constant 0 : i32
    %c0_i32_0 = arith.constant 0 : i32
    %c0_i32_1 = arith.constant 0 : i32
    return %c0_i32, %c0_i32_0 : i32, i32
  }
  func.func @transform_16(%arg0: i32) -> (i32, i32, i32) {
    %c0_i32 = arith.constant 0 : i32
    %c0_i32_0 = arith.constant 0 : i32
    %c0_i32_1 = arith.constant 0 : i32
    return %arg0, %c0_i32, %c0_i32_0 : i32, i32, i32
  }
}

</mosaic_0001>

<bundles_post_ra>
// kernel: tpu_custom_call.1
= control target key start
LH: loop header
LB: loop body
LE: loop exit
PB: predicated region body
PF: predicated region fallthrough
CT: control target
= control target key end

     0   :  { %s2579_s0 = inlined_call_operand.vmem [shape: f32[2,8,32], index: 0, kind: input, shape index: {}]   ;;  %s2580_s1 = inlined_call_operand.vmem [shape: f32[2,8,32], index: 1, kind: input, shape index: {}]   ;;  %s2581_s2 = inlined_call_operand.vmem [shape: bf16[32,32], index: 2, kind: input, shape index: {}]   ;;  %s2582_s3 = inlined_call_operand.vmem [shape: f32[1,32], index: 3, kind: input, shape index: {}]   ;;  %s2583_s4 = inlined_call_operand.hbm [shape: bf16[32,64], index: 4, kind: input, shape index: {}]   ;;  %s2584_s5 = inlined_call_operand.vmem [shape: f32[1,64], index: 5, kind: input, shape index: {}]   ;;  %s2585_s6 = inlined_call_operand.hbm [shape: bf16[32,32], index: 6, kind: input, shape index: {}]   ;;  %s2586_s7 = inlined_call_operand.vmem [shape: f32[1,32], index: 7, kind: input, shape index: {}]   ;;  %s2587_s8 = inlined_call_operand.vmem [shape: f32[1,32], index: 8, kind: input, shape index: {}]   ;;  %s2588_s9 = inlined_call_operand.vmem [shape: f32[1,32], index: 9, kind: input, shape index: {}]   ;;  %s2589_s10 = inlined_call_operand.hbm [shape: bf16[32,64], index: 10, kind: input, shape index: {}]   ;;  %s2590_s11 = inlined_call_operand.vmem [shape: f32[1,64], index: 11, kind: input, shape index: {}]   ;;  %s2591_s12 = inlined_call_operand.vmem [shape: bf16[64,32], index: 12, kind: input, shape index: {}]   ;;  %s2592_s13 = inlined_call_operand.vmem [shape: f32[1,32], index: 13, kind: input, shape index: {}]   ;;  %s2593_s14 = inlined_call_operand.vmem [shape: f32[1,32], index: 14, kind: input, shape index: {}]   ;;  %s2594_s15 = inlined_call_operand.vmem [shape: f32[1,32], index: 15, kind: input, shape index: {}]   ;;  %s2595_s16 = inlined_call_operand.hbm [shape: f32[2,8,32], index: 16, kind: output, shape index: {}]  }
   0x1   :  { %2602 = sst [smem:[#allocation18_spill]] %s2579_s0 }
   0x2   :  { %2603 = sst [smem:[#allocation19_spill]] %s2583_s4 }
   0x3   :  { %2604 = sst [smem:[#allocation20_spill]] %s2585_s6 }
   0x4   :  { %2605 = sst [smem:[#allocation21_spill]] %s2594_s15 }
   0x5   :  { %21 = vsyncpa [#allocation3], 0 }
   0x6   :  { %22 = vsyncpa [#allocation6], 0 }
   0x7   :  { %23 = vsyncpa [#allocation4], 0 }
   0x8   :  { %25 = vsyncpa [#allocation4 + $0x1], 0  ;;  %s2166_s21 = smov 0   ;;  %s2168_s22 = smov 0  }
   0x9   :  { %s2170_s23 = smov 0   ;;  %s2172_s24 = smov 0  }
   0xa LB: > { %2606 = sst [smem:[#allocation12_spill]] %s2052_s21  ;;  %s2187_s25 = sadd.s32 4294967295, %s2064_s24   ;;  %s2064_s24 = sphi %s2172_s24, %s2623_s24   ;;  %s2060_s23 = sphi %s2170_s23, %s2625_s23   ;;  %s2056_s22 = sphi %s2168_s22, %s2627_s22   ;;  %s2052_s21 = sphi %s2166_s21, %s2626_s21  }
   0xb   : > { %2607 = sst [smem:[#allocation13_spill]] %s2060_s23  ;;  %s1691_s26 = sadd.s32 4294967294, %s2064_s24  }
   0xc   : > { %2608 = sst [smem:[#allocation14_spill]] %s2064_s24  ;;  %s2191_s27 = sadd.s32 1, %s2064_s24  }
   0xd   : > { %2609 = sst [smem:[#allocation15_spill]] %s2191_s27  ;;  %s384_s28 = sadd.s32 1, %s2060_s23 }
   0xe   : > { %s381_s29 = ssub.s32 %s2064_s24, %s2191_s27  ;;  %p394_p0 = scmp.ne.s32.totalorder %s2060_s23, %s2056_s22 }
   0xf   : > { %p382_p1 = scmp.eq.s32.totalorder %s381_s29, 0  ;;  %p395_p2 = scmp.eq.s32.totalorder %s2187_s25, 1 }
  0x10   : > { %p400_p3 = scmp.ne.s32.totalorder %s2056_s22, %s2052_s21  ;;  %p401_p4 = scmp.eq.s32.totalorder %s1691_s26, 1 }
  0x11   : > { %s2202_s30 = scalar_select %p382_p1, %s2060_s23, %s384_s28  }
  0x12   : > { %p2204_p5 = por %p395_p2, %p394_p0  ;;  %p2208_p6 = por %p401_p4, %p400_p3 }
  0x13   : > { %2610 = sst [smem:[#allocation16_spill]] %s2202_s30  ;;  %p1692_p7 = scmp.ge.s32.totalorder %s2064_s24, 1 }
  0x14   : > { %s2612_s17 = scalar_select %p2208_p6, 1, 0 }
  0x15   : > { %p408_p8 = scmp.lt.s32.totalorder %s2064_s24, 3  ;;  %p1809_p9 = scmp.eq.s32.totalorder %s2187_s25, 0 }
  0x16   : > { %2613 = sst [smem:[#allocation17_spill]] %s2612_s17  ;;  %s2066_s27 = smov [#allocation5]  }
  0x17   : > { %p2215_p10 = pnand %p1692_p7, %p408_p8  ;;  %s2615_s6 = sld [smem:[#allocation20_spill]] }
  0x18   : > { %s2616_s4 = sld [smem:[#allocation19_spill]]  ;;  %s444_s17 = sshll.u32 %s2066_s27, 4  ;;  %s445_s17 = int_to_ptr.vmem [resolvable:$true] %s444_s17 }
  0x19   : > { %p1795_p11 = pneg %p2215_p10  ;;  %s2067_s19 = smov 64  }
  0x1a   : > { %s2068_s20 = smov 4   ;;  %s2070_s24 = smov [#allocation7]  }
  0x1b   : > { %p2229_p12 = pnand %p1809_p9, %p1795_p11  ;;  %s467_s15 = sshll.u32 %s2070_s24, 4  ;;  %s468_s15 = int_to_ptr.vmem [resolvable:$true] %s467_s15 }
  0x1d   : > { %s442_s26 = sshll.u32 %s2615_s6, 4  ;;  %s2069_s6 = smov [#allocation2]   ;;  %s443_s26 = int_to_ptr.hbm [resolvable:$true] %s442_s26 }
  0x1e   : > { %s425_s30 = sshll.u32 %s2616_s4, 4  ;;  %s427_s21 = sshll.u32 %s2069_s6, 4  ;;  %s426_s30 = int_to_ptr.hbm [resolvable:$true] %s425_s30  ;;  %s428_s21 = int_to_ptr.vmem [resolvable:$true] %s427_s21 }
  0x1f   : > { %1801 = dma.hbm_to_vmem [thread:$0]  (!%p2229_p12), %s443_s26, 256, %s445_s17, [#allocation6], %s2067_s19, %s2067_s19, %s2068_s20  }
  0x20   : > { %s465_s4 = sshll.u32 %s2589_s10, 4  ;;  %512 = sbr.rel (%p2215_p10) target bundleno = 1964 (0x7ac), region = 84  ;;  %s466_s4 = int_to_ptr.hbm [resolvable:$true] %s465_s4 }
  0x21   : > { %1798 = dma.hbm_to_vmem [thread:$0]  (!%p2229_p12), %s426_s30, 256, %s428_s21, [#allocation3], %s2067_s19, %s2067_s19, %s2068_s20  }
  0x22   : > { %1804 = dma.hbm_to_vmem [thread:$0]  (!%p2229_p12), %s466_s4, 256, %s468_s15, [#allocation6], %s2067_s19, %s2067_s19, %s2068_s20  }
  0x25   : > { %2039 = dma.done.wait (%p1809_p9), [#allocation3], 256  }
  0x26   : > { %2041 = vsyncadd (%p1809_p9), [#allocation3], 4294967040 }
  0x27   : > { %2043 = dma.done.wait (%p1809_p9), [#allocation6], 512  }
  0x28   : > { %2045 = vsyncadd (%p1809_p9), [#allocation6], 4294966784  ;;  %p576_p13 = scmp.lt.s32.totalorder %s2187_s25, 1  ;;  %s2618_s23 = sld [smem:[#allocation18_spill]]  ;;  %v1770_v0 = vld [vmem:[%s2581_s2 + $0x8] sm:$0xff]  ;;  %v1769_v2 = vld [vmem:[%s2581_s2] sm:$0xff] }
  0x29   : > { %v1772_v1 = vld [vmem:[#allocation2 + $0x8] sm:$0xff]  ;;  %v1771_v3 = vld [vmem:[#allocation2] sm:$0xff]  ;;  %619 = vmatpush.bf16.msra.mxu0 %v1770_v0  ;;  %vm609_vm0 = vcmask 261120   ;;  %s2071_s15 = smov 104   ;;  %s2072_s21 = smov 120   ;;  %vm673_vm1 = vcmask 1047556  }
  0x2a   : > { %s577_s6 = scalar_select %p576_p13, %s2187_s25, 1  ;;  %655 = vmatpush.bf16.msra.mxu1 %v1772_v1  ;;  %v1873_v8 = vld [vmem:[%s2582_s3] ss:$0 sm:$0xff]  ;;  %v2074_v17 = vmov 1983009808   ;;  %vm1037_vm2 = vcmask 64512  }
  0x2b   : > { %v1874_v9 = vld [vmem:[%s2584_s5] ss:$0 sm:$0xff]  ;;  %v678_v18 = vunpack.c.l.s4 %v2074_v17  ;;  %v2075_v31 = vmov 1934713408   ;;  %vm1169_vm3 = vcmask 1043456   ;;  %s2077_s27 = smov 16  }
  0x2c   : > { %s1702_s4 = sshll.u32 %s577_s6, 3  ;;  %v702_v32 = vunpack.c.l.s4 %v2075_v31  ;;  %s2078_s30 = smov 8   ;;  %vm1366_vm4 = vcmask 130048   ;;  %vm1368_vm5 = vcmask 195584   ;;  %vm1522_vm10 = vcmask 523264  }
  0x2d   : > { %s583_s17 = scalar_lea.vmem %s2580_s1, %s1702_s4  ;;  %620 = vmatpush.bf16.msra.mxu0 %v1769_v2  ;;  %v2289_v25 = vunpack.c.0.s8 %v678_v18  ;;  %s573_s20 = sand.u32 1, %s2056_s22  }
  0x2e   : > { %s579_s24 = scalar_lea.vmem %s2618_s23, %s1702_s4  ;;  %v586_v5 = vld [vmem:[%s583_s17] sm:$0xff]  ;;  %656 = vmatpush.bf16.msra.mxu1 %v1771_v3  ;;  %s2073_s23 = smov 112   ;;  %v2304_v41 = vunpack.c.0.s8 %v702_v32 }
  0x2f   : > { %v2266_v4 = vld [vmem:[%s579_s24] sm:$0xff]  ;;  %v588_v7 = vpack.c.bf16 %v586_v5, %v586_v5  ;;  %s2076_s24 = smov 96   ;;  %s2079_s17 = smov 24  }
  0x30   : > { %v587_v6 = vpack.c.bf16 %v2266_v4, %v2266_v4  ;;  %s1701_s28 = sshll.u32 %s573_s20, 3  ;;  %s1766_s29 = sshll.u32 %s2187_s25, 3 }
  0x31   : > { %1721 = vmatmul.msk.bf16.vlgmr.msra.gmra.mxu1 %vm609_vm0, %v588_v7  ;;  %s1574_s26 = scalar_lea.sflag [#allocation4], %s573_s20 }
  0x32   : > { %1712 = vmatmul.msk.bf16.vlgmr.msra.gmra.mxu0 %vm609_vm0, %v587_v6 }
  0xae   : > { %v658_v11 = vpop.f32.mrf.mxu1 }
  0xaf   : > { %v622_v10 = vpop.f32.mrf.mxu0  ;;  %v2278_v13 = vadd.f32 %v1874_v9, %v658_v11 }
  0xb0   : > { %v623_v12 = vadd.f32 %v1873_v8, %v622_v10 }
  0xb1   : > { %794 = vrot.lane.b32.xlu1 %v2278_v13, %s2071_s15  ;;  %788 = vrot.lane.b32.xlu0 %v2278_v13, %s2072_s21  ;;  %v799_v34 = vrot.slane %v2278_v13, 4 }
  0xb2   : > { %666 = vrot.lane.b32.xlu2 %v623_v12, %s2073_s23  ;;  %v675_v24 = vrot.slane %v623_v12, 4 }
  0xb6   : > { %v660_v14 = vpop.f32.mrf.mxu1 }
  0xb7   : > { %v624_v15 = vpop.f32.mrf.mxu0 }
  0xb9   : > { %791 = vrot.lane.b32.xlu0 %v2278_v13, %s2073_s23  ;;  %663 = vrot.lane.b32.xlu1 %v623_v12, %s2072_s21  ;;  %s1584_s23 = scalar_lea.hbm %s2595_s16, %s1766_s29 }
  0xba   : > { %669 = vrot.lane.b32.xlu2 %v623_v12, %s2071_s15  ;;  %s1588_s18 = sshll.u32 %s1584_s23, 4  ;;  %s1589_s18 = int_to_ptr.hbm [resolvable:$true] %s1588_s18 }
  0xbb   : > { %s2008_s19 = sshra.s32 %s1589_s18, 4  ;;  %s2009_s19 = int_to_ptr.hbm [resolvable:$true] %s2008_s19 }
  0xbc   : > { %s2010_s29 = scalar_lea.hbm %s2009_s19, 8  ;;  %p2015_p3 = scmp.lt.s32.totalorder %s2009_s19, %s2595_s16 }
  0xbd   : > { %p2011_p0 = scmp.ne.s32.totalorder %s2009_s19, %s2010_s29 }
  0xbf   : > { %p2012_p1 = pnand %p2011_p0, %p2204_p5 }
  0xc1   : > { %p2013_p2 = pneg %p2012_p1 }
 0x10c   : > { %v667_v16 = vpop.permute.xlu2 %666 }
 0x10d   : > { %v672_v19 = vrot.slane %v667_v16, 4  ;;  %v676_v28 = vsel %vm673_vm1, %v667_v16, %v675_v24 }
 0x10e   : > { %v684_v36 = vperm.slane %v676_v28, %v2289_v25 }
 0x10f   : > { %v674_v27 = vsel %vm673_vm1, %v672_v19, %v623_v12 }
 0x110   : > { %v680_v35 = vperm.slane %v674_v27, %v2289_v25  ;;  %v711_v50 = vrot.slane %v684_v36, 4 }
 0x112   : > { %v699_v49 = vrot.slane %v680_v35, 4 }
 0x114   : > { %v670_v29 = vpop.permute.xlu2 %669 }
 0x115   : > { %v685_v37 = vrot.slane %v670_v29, 4 }
 0x123   : > { %v2283_v20 = vpop.permute.xlu1 %794  ;;  %v2285_v21 = vpop.permute.xlu0 %788 }
 0x124   : > { %v809_v22 = vrot.slane %v2283_v20, 4  ;;  %v811_v23 = vrot.slane %v2285_v21, 4 }
 0x126   : > { %v812_v26 = vsel %vm673_vm1, %v2283_v20, %v811_v23  ;;  %v810_v30 = vsel %vm673_vm1, %v809_v22, %v2285_v21 }
 0x127   : > { %v820_v33 = vperm.slane %v812_v26, %v2289_v25  ;;  %v816_v38 = vperm.slane %v810_v30, %v2289_v25 }
 0x129   : > { %v833_v45 = vrot.slane %v820_v33, 4  ;;  %v821_v51 = vrot.slane %v816_v38, 4 }
 0x12b   : > { %v2302_v39 = vpop.permute.xlu0 %791  ;;  %v664_v40 = vpop.permute.xlu1 %663 }
 0x12c   : > { %v797_v42 = vrot.slane %v2302_v39, 4  ;;  %v800_v43 = vsel %vm673_vm1, %v2302_v39, %v799_v34  ;;  %v686_v44 = vsel %vm673_vm1, %v685_v37, %v664_v40  ;;  %v687_v47 = vrot.slane %v664_v40, 4 }
 0x12d   : > { %v808_v46 = vperm.slane %v800_v43, %v2289_v25  ;;  %v692_v48 = vperm.slane %v686_v44, %v2289_v25 }
 0x12e   : > { %v798_v52 = vsel %vm673_vm1, %v797_v42, %v2278_v13  ;;  %v688_v56 = vsel %vm673_vm1, %v670_v29, %v687_v47 }
 0x12f   : > { %v804_v53 = vperm.slane %v798_v52, %v2289_v25  ;;  %v834_v54 = vsel %vm673_vm1, %v833_v45, %v808_v46  ;;  %v835_v55 = vrot.slane %v808_v46, 4  ;;  %v696_v58 = vperm.slane %v688_v56, %v2289_v25 }
 0x130   : > { %v840_v57 = vperm.slane %v834_v54, %v2304_v41  ;;  %v697_v59 = vrot.slane %v692_v48, 4  ;;  %v700_v60 = vsel %vm673_vm1, %v692_v48, %v699_v49 }
 0x131   : > { %v822_v61 = vsel %vm673_vm1, %v821_v51, %v804_v53  ;;  %v823_v62 = vrot.slane %v804_v53, 4  ;;  %v836_v63 = vsel %vm673_vm1, %v820_v33, %v835_v55  ;;  %v708_v0 = vperm.slane %v700_v60, %v2304_v41 }
 0x132   : > { %v828_v1 = vperm.slane %v822_v61, %v2304_v41  ;;  %v844_v2 = vperm.slane %v836_v63, %v2304_v41  ;;  %v698_v3 = vsel %vm673_vm1, %v697_v59, %v680_v35  ;;  %v709_v7 = vrot.slane %v696_v58, 4 }
 0x133   : > { %v824_v5 = vsel %vm673_vm1, %v816_v38, %v823_v62  ;;  %v704_v6 = vperm.slane %v698_v3, %v2304_v41  ;;  %v712_v8 = vsel %vm673_vm1, %v696_v58, %v711_v50  ;;  %v849_v11 = vrot.slane %v840_v57, 4 }
 0x134   : > { %v832_v9 = vperm.slane %v824_v5, %v2304_v41  ;;  %v845_v10 = vrot.slane %v828_v1, 4  ;;  %v851_v12 = vrot.slane %v844_v2, 4  ;;  %v710_v14 = vsel %vm673_vm1, %v709_v7, %v684_v36 }
 0x135   : > { %v720_v15 = vperm.slane %v712_v8, %v2304_v41  ;;  %v721_v16 = vrot.slane %v704_v6, 4  ;;  %v723_v17 = vrot.slane %v708_v0, 4  ;;  %v716_v23 = vperm.slane %v710_v14, %v2304_v41 }
 0x136   : > { %v847_v18 = vrot.slane %v832_v9, 4  ;;  %v852_v19 = vsel %vm673_vm1, 0.0, %v851_v12  ;;  %v864_v22 = vsel %vm673_vm1, %v851_v12, %v840_v57  ;;  %v850_v33 = vsel %vm673_vm1, 0.0, %v849_v11 }
 0x137   : > { %v868_v24 = vperm.slane %v864_v22, %v2289_v25  ;;  %v869_v26 = vrot.slane %v852_v19, 4  ;;  %v722_v27 = vsel %vm673_vm1, 0.0, %v721_v16  ;;  %v724_v28 = vsel %vm673_vm1, 0.0, %v723_v17 }
 0x138   : > { %v725_v29 = vrot.slane %v716_v23, 4  ;;  %v727_v30 = vrot.slane %v720_v15, 4  ;;  %v729_v31 = vsel %vm673_vm1, %v723_v17, %v704_v6  ;;  %v734_v32 = vrot.slane %v724_v28, 4 }
 0x139   : > { %v733_v34 = vperm.slane %v729_v31, %v2289_v25  ;;  %v848_v35 = vsel %vm673_vm1, 0.0, %v847_v18  ;;  %v853_v36 = vsel %vm673_vm1, %v847_v18, %v828_v1  ;;  %v870_v49 = vsel %vm673_vm1, %v869_v26, %v850_v33 }
 0x13a   : > { %v726_v37 = vsel %vm673_vm1, 0.0, %v725_v29  ;;  %v728_v38 = vsel %vm673_vm1, 0.0, %v727_v30  ;;  %v735_v40 = vsel %vm673_vm1, %v734_v32, %v722_v27  ;;  %v740_v42 = vsel %vm673_vm1, %v727_v30, %v716_v23 }
 0x13b   : > { %v739_v43 = vperm.slane %v735_v40, %v2289_v25  ;;  %v744_v44 = vperm.slane %v740_v42, %v2289_v25  ;;  %v745_v45 = vrot.slane %v728_v38, 4  ;;  %v753_v46 = vrot.slane %v733_v34, 4 }
 0x13c   : > { %v857_v47 = vperm.slane %v853_v36, %v2289_v25  ;;  %v858_v48 = vrot.slane %v848_v35, 4  ;;  %v889_v50 = vrot.slane %v868_v24, 4  ;;  %v846_v52 = vsel %vm673_vm1, 0.0, %v845_v10 }
 0x13d   : > { %v746_v51 = vsel %vm673_vm1, %v745_v45, %v726_v37  ;;  %v874_v53 = vperm.slane %v870_v49, %v2289_v25  ;;  %v765_v54 = vrot.slane %v744_v44, 4  ;;  %v751_v61 = vrot.slane %v739_v43, 4 }
 0x13e   : > { %v859_v55 = vsel %vm673_vm1, %v858_v48, %v846_v52  ;;  %v877_v56 = vrot.slane %v857_v47, 4  ;;  %v750_v57 = vperm.slane %v746_v51, %v2289_v25  ;;  %v754_v63 = vsel %vm673_vm1, %v739_v43, %v753_v46 }
 0x13f   : > { %v863_v58 = vperm.slane %v859_v55, %v2289_v25  ;;  %v890_v59 = vsel %vm673_vm1, %v874_v53, %v889_v50  ;;  %v887_v60 = vrot.slane %v874_v53, 4  ;;  %v762_v11 = vperm.slane %v754_v63, %v2304_v41 }
 0x140   : > { %v898_v62 = vperm.slane %v890_v59, %v2304_v41  ;;  %v766_v0 = vsel %vm673_vm1, %v750_v57, %v765_v54  ;;  %v763_v1 = vrot.slane %v750_v57, 4  ;;  %v752_v12 = vsel %vm673_vm1, %v751_v61, %v733_v34 }
 0x141   : > { %v878_v2 = vsel %vm673_vm1, %v863_v58, %v877_v56  ;;  %v875_v3 = vrot.slane %v863_v58, 4  ;;  %v888_v5 = vsel %vm673_vm1, %v887_v60, %v868_v24  ;;  %v774_v6 = vperm.slane %v766_v0, %v2304_v41 }
 0x142   : > { %v886_v7 = vperm.slane %v878_v2, %v2304_v41  ;;  %v903_v8 = vrot.slane %v898_v62, 4  ;;  %v894_v9 = vperm.slane %v888_v5, %v2304_v41  ;;  %v764_v14 = vsel %vm673_vm1, %v763_v1, %v744_v44 }
 0x143   : > { %v876_v10 = vsel %vm673_vm1, %v875_v3, %v857_v47  ;;  %v779_v22 = vrot.slane %v774_v6, 4  ;;  %v770_v23 = vperm.slane %v764_v14, %v2304_v41  ;;  %v758_v28 = vperm.slane %v752_v12, %v2304_v41 }
 0x144   : > { %v904_v15 = vsel %vm673_vm1, %v903_v8, %v886_v7  ;;  %v882_v16 = vperm.slane %v876_v10, %v2304_v41  ;;  %v899_v17 = vrot.slane %v894_v9, 4  ;;  %v905_v18 = vrot.slane %v886_v7, 4 }
 0x145   : > { %v909_v19 = vpack.c.bf16 %v904_v15, %v904_v15  ;;  %v775_v33 = vrot.slane %v770_v23, 4  ;;  %v781_v34 = vrot.slane %v762_v11, 4  ;;  %v780_v38 = vsel %vm673_vm1, %v779_v22, %v762_v11 }
 0x146   : > { %v900_v24 = vsel %vm673_vm1, %v899_v17, %v882_v16  ;;  %v906_v26 = vsel %vm673_vm1, %v898_v62, %v905_v18  ;;  %v901_v27 = vrot.slane %v882_v16, 4  ;;  %v777_v40 = vrot.slane %v758_v28, 4 }
 0x147   : > { %v1080_v29 = vsel %vm1037_vm2, %v909_v19, 0  ;;  %v907_v30 = vpack.c.bf16 %v900_v24, %v900_v24  ;;  %v910_v31 = vpack.c.bf16 %v906_v26, %v906_v26  ;;  %v776_v43 = vsel %vm673_vm1, %v775_v33, %v758_v28 }
 0x148   : > { %1089 = vmatpush.bf16.xpose.msrb.mxu0 %v1080_v29  ;;  %v902_v32 = vsel %vm673_vm1, %v894_v9, %v901_v27  ;;  %v782_v44 = vsel %vm673_vm1, %v774_v6, %v781_v34  ;;  %v785_v45 = vpack.c.bf16 %v780_v38, %v780_v38  ;;  %v778_v46 = vsel %vm673_vm1, %v770_v23, %v777_v40 }
 0x149   : > { %v1042_v35 = vsel %vm1037_vm2, %v907_v30, 0  ;;  %v1099_v36 = vsel %vm1037_vm2, %v910_v31, 0  ;;  %v908_v37 = vpack.c.bf16 %v902_v32, %v902_v32  ;;  %v783_v47 = vpack.c.bf16 %v776_v43, %v776_v43 }
 0x14a   : > { %1051 = vmatpush.bf16.xpose.msra.mxu2 %v1042_v35  ;;  %1108 = vmatpush.bf16.xpose.msrb.mxu1 %v1099_v36  ;;  %v786_v48 = vpack.c.bf16 %v782_v44, %v782_v44  ;;  %v784_v49 = vpack.c.bf16 %v778_v46, %v778_v46  ;;  %v1863_v2 = vpack.i.bf16 %v2285_v21, %v2278_v13 }
 0x14b   : > { %v1061_v42 = vsel %vm1037_vm2, %v908_v37, 0  ;;  %v1868_v3 = vpack.i.bf16 %v2283_v20, %v2302_v39 }
 0x14c   : > { %1070 = vmatpush.bf16.xpose.msra.mxu3 %v1061_v42 }
 0x14f   : > { %1724 = vmatmul.msk.bf16.vlgmr.msrb.gmra.mxu0 %vm1037_vm2, %v785_v45 }
 0x151   : > { %1722 = vmatmul.msk.bf16.vlgmr.msra.gmra.mxu2 %vm1037_vm2, %v783_v47  ;;  %1725 = vmatmul.msk.bf16.vlgmr.msrb.gmra.mxu1 %vm1037_vm2, %v786_v48 }
 0x153   : > { %1723 = vmatmul.msk.bf16.vlgmr.msra.gmra.mxu3 %vm1037_vm2, %v784_v49 }
 0x1cc   : > { %v1091_v50 = vpop.f32.mrf.mxu0 }
 0x1cd   : > { %v1116_v51 = vmul.f32 0.35355338, %v1091_v50 }
 0x1ce   : > { %v1110_v52 = vpop.f32.mrf.mxu1 }
 0x1cf   : > { %v1124_v53 = vsel %vm1037_vm2, %v1116_v51, -inf  ;;  %v1117_v54 = vmul.f32 0.35355338, %v1110_v52 }
 0x1d0   : > { %1125 = vmax.xlane.f32.xlu2 %v1124_v53 }
 0x1d1   : > { %v1127_v61 = vsel %vm1037_vm2, %v1117_v54, -inf }
 0x1d4   : > { %v1053_v55 = vpop.f32.mrf.mxu2  ;;  %v1093_v56 = vpop.f32.mrf.mxu0 }
 0x1d5   : > { %v1114_v57 = vmul.f32 0.35355338, %v1053_v55 }
 0x1d6   : > { %v1072_v58 = vpop.f32.mrf.mxu3  ;;  %v1112_v59 = vpop.f32.mrf.mxu1 }
 0x1d7   : > { %v1115_v60 = vmul.f32 0.35355338, %v1072_v58  ;;  %v1118_v62 = vsel %vm1037_vm2, %v1114_v57, -inf }
 0x1d8   : > { %1128 = vmax.xlane.f32.xlu2 %v1127_v61  ;;  %1119 = vmax.xlane.f32.xlu0 %v1118_v62 }
 0x1d9   : > { %v1121_v63 = vsel %vm1037_vm2, %v1115_v60, -inf }
 0x1da   : > { %1122 = vmax.xlane.f32.xlu1 %v1121_v63 }
 0x1dc   : > { %v1055_v0 = vpop.f32.mrf.mxu2 }
 0x1de   : > { %v1074_v1 = vpop.f32.mrf.mxu3 }
 0x1ec   : > { %1864 = vrot.lane.b32.xlu0 %v1863_v2, %s2076_s24 }
 0x1f3   : > { %1869 = vrot.lane.b32.xlu1 %v1868_v3, %s2076_s24 }
 0x243   : > { %v1126_v5 = vpop.xlane.xlu2 %1125 }
 0x244   : > { %v1132_v6 = vsub.f32 %v1116_v51, %v1126_v5 }
 0x246   : > { %v1138_v7 = vmul.f32 1.442695, %v1132_v6 }
 0x248   : > { %1882 = vpow2.f32 %v1138_v7 }
 0x24b   : > { %v1120_v8 = vpop.xlane.xlu0 %1119  ;;  %v1129_v21 = vpop.xlane.xlu2 %1128 }
 0x24c   : > { %v1130_v9 = vsub.f32 %v1114_v57, %v1120_v8  ;;  %v1133_v20 = vsub.f32 %v1117_v54, %v1129_v21 }
 0x24d   : > { %v1123_v10 = vpop.xlane.xlu1 %1122 }
 0x24e   : > { %v2397_v11 = vpop.eup %1882  ;;  %v1134_v12 = vmul.f32 1.442695, %v1130_v9  ;;  %v1131_v14 = vsub.f32 %v1115_v60, %v1123_v10  ;;  %v1140_v17 = vmul.f32 1.442695, %v1133_v20 }
 0x24f   : > { %v1148_v13 = vsel %vm1037_vm2, %v2397_v11, 0.0 }
 0x250   : > { %1149 = vadd.xlane.f32.xlu0 %v1148_v13  ;;  %1884 = vpow2.f32 %v1134_v12  ;;  %v1136_v15 = vmul.f32 1.442695, %v1131_v14 }
 0x252   : > { %1886 = vpow2.f32 %v1136_v15 }
 0x253   : > { %1888 = vpow2.f32 %v1140_v17 }
 0x256   : > { %v2401_v39 = vpop.eup %1884 }
 0x257   : > { %v1142_v16 = vsel %vm1037_vm2, %v2401_v39, 0.0 }
 0x258   : > { %1143 = vadd.xlane.f32.xlu2 %v1142_v16  ;;  %v2405_v18 = vpop.eup %1886 }
 0x259   : > { %v1145_v22 = vsel %vm1037_vm2, %v2405_v18, 0.0  ;;  %v2409_v26 = vpop.eup %1888 }
 0x25a   : > { %v1151_v32 = vsel %vm1037_vm2, %v2409_v26, 0.0 }
 0x25e   : > { %v1865_v19 = vpop.permute.xlu0 %1864 }
 0x25f   : > { %v1867_v23 = vunpack.i.h.bf16 %v1865_v19  ;;  %v1866_v24 = vunpack.i.l.bf16 %v1865_v19 }
 0x260   : > { %1146 = vadd.xlane.f32.xlu2 %v1145_v22 }
 0x261   : > { %v937_v28 = vrot.slane %v1867_v23, 4  ;;  %v925_v29 = vrot.slane %v1866_v24, 4 }
 0x265   : > { %v1870_v27 = vpop.permute.xlu1 %1869 }
 0x266   : > { %v1872_v30 = vunpack.i.h.bf16 %v1870_v27  ;;  %v1871_v31 = vunpack.i.l.bf16 %v1870_v27 }
 0x268   : > { %v935_v33 = vrot.slane %v1872_v30, 4  ;;  %v923_v34 = vrot.slane %v1871_v31, 4  ;;  %v926_v35 = vsel %vm673_vm1, %v1871_v31, %v925_v29  ;;  %v938_v36 = vsel %vm673_vm1, %v1872_v30, %v937_v28  ;;  %1152 = vadd.xlane.f32.xlu2 %v1151_v32 }
 0x269   : > { %v934_v37 = vperm.slane %v926_v35, %v2289_v25  ;;  %v946_v38 = vperm.slane %v938_v36, %v2289_v25 }
 0x26a   : > { %v924_v40 = vsel %vm673_vm1, %v923_v34, %v1866_v24  ;;  %v936_v42 = vsel %vm673_vm1, %v935_v33, %v1867_v23 }
 0x26b   : > { %v930_v43 = vperm.slane %v924_v40, %v2289_v25  ;;  %v942_v44 = vperm.slane %v936_v42, %v2289_v25  ;;  %v959_v45 = vrot.slane %v946_v38, 4  ;;  %v961_v46 = vrot.slane %v934_v37, 4 }
 0x26d   : > { %v947_v47 = vrot.slane %v942_v44, 4  ;;  %v949_v48 = vrot.slane %v930_v43, 4  ;;  %v960_v49 = vsel %vm673_vm1, %v959_v45, %v934_v37  ;;  %v962_v50 = vsel %vm673_vm1, %v946_v38, %v961_v46 }
 0x26e   : > { %v966_v51 = vperm.slane %v960_v49, %v2304_v41  ;;  %v970_v52 = vperm.slane %v962_v50, %v2304_v41 }
 0x26f   : > { %v948_v53 = vsel %vm673_vm1, %v947_v47, %v930_v43  ;;  %v950_v54 = vsel %vm673_vm1, %v942_v44, %v949_v48 }
 0x270   : > { %v954_v55 = vperm.slane %v948_v53, %v2304_v41  ;;  %v958_v56 = vperm.slane %v950_v54, %v2304_v41  ;;  %v975_v57 = vrot.slane %v966_v51, 4  ;;  %v977_v58 = vrot.slane %v970_v52, 4 }
 0x272   : > { %v971_v59 = vrot.slane %v954_v55, 4  ;;  %v973_v60 = vrot.slane %v958_v56, 4  ;;  %v978_v61 = vsel %vm673_vm1, 0.0, %v977_v58  ;;  %v990_v62 = vsel %vm673_vm1, %v977_v58, %v966_v51 }
 0x273   : > { %v995_v63 = vrot.slane %v978_v61, 4  ;;  %v976_v1 = vsel %vm673_vm1, 0.0, %v975_v57  ;;  %v994_v2 = vperm.slane %v990_v62, %v2289_v25 }
 0x274   : > { %v974_v0 = vsel %vm673_vm1, 0.0, %v973_v60  ;;  %v979_v3 = vsel %vm673_vm1, %v973_v60, %v954_v55  ;;  %v972_v8 = vsel %vm673_vm1, 0.0, %v971_v59 }
 0x275   : > { %v984_v5 = vrot.slane %v974_v0, 4  ;;  %v983_v6 = vperm.slane %v979_v3, %v2289_v25  ;;  %v996_v7 = vsel %vm673_vm1, %v995_v63, %v976_v1  ;;  %v1015_v10 = vrot.slane %v994_v2, 4 }
 0x276   : > { %v1000_v9 = vperm.slane %v996_v7, %v2289_v25 }
 0x277   : > { %v985_v12 = vsel %vm673_vm1, %v984_v5, %v972_v8  ;;  %v1003_v14 = vrot.slane %v983_v6, 4 }
 0x278   : > { %v989_v13 = vperm.slane %v985_v12, %v2289_v25  ;;  %v1016_v21 = vsel %vm673_vm1, %v1000_v9, %v1015_v10  ;;  %v1013_v15 = vrot.slane %v1000_v9, 4 }
 0x279   : > { %v1024_v20 = vperm.slane %v1016_v21, %v2304_v41 }
 0x27a   : > { %v1004_v16 = vsel %vm673_vm1, %v989_v13, %v1003_v14  ;;  %v1001_v17 = vrot.slane %v989_v13, 4  ;;  %v1014_v19 = vsel %vm673_vm1, %v1013_v15, %v994_v2 }
 0x27b   : > { %v1012_v22 = vperm.slane %v1004_v16, %v2304_v41  ;;  %v1029_v23 = vrot.slane %v1024_v20, 4  ;;  %v1020_v24 = vperm.slane %v1014_v19, %v2304_v41 }
 0x27c   : > { %v1002_v27 = vsel %vm673_vm1, %v1001_v17, %v983_v6 }
 0x27d   : > { %v1030_v28 = vsel %vm673_vm1, %v1029_v23, %v1012_v22  ;;  %v1008_v29 = vperm.slane %v1002_v27, %v2304_v41  ;;  %v1025_v30 = vrot.slane %v1020_v24, 4  ;;  %v1031_v31 = vrot.slane %v1012_v22, 4 }
 0x27e   : > { %v1035_v32 = vpack.c.bf16 %v1030_v28, %v1030_v28 }
 0x27f   : > { %v1026_v33 = vsel %vm673_vm1, %v1025_v30, %v1008_v29  ;;  %v1032_v34 = vsel %vm673_vm1, %v1024_v20, %v1031_v31  ;;  %v1027_v35 = vrot.slane %v1008_v29, 4 }
 0x280   : > { %v1209_v36 = vsel %vm1169_vm3, %v1035_v32, 0  ;;  %v1033_v37 = vpack.c.bf16 %v1026_v33, %v1026_v33  ;;  %v1036_v38 = vpack.c.bf16 %v1032_v34, %v1032_v34 }
 0x281   : > { %1218 = vmatpush.bf16.msra.mxu0 %v1209_v36  ;;  %v1028_v40 = vsel %vm673_vm1, %v1020_v24, %v1027_v35 }
 0x282   : > { %v1171_v42 = vsel %vm1169_vm3, %v1033_v37, 0  ;;  %v1228_v43 = vsel %vm1169_vm3, %v1036_v38, 0  ;;  %v1034_v44 = vpack.c.bf16 %v1028_v40, %v1028_v40 }
 0x283   : > { %1180 = vmatpush.bf16.msrb.mxu2 %v1171_v42  ;;  %1237 = vmatpush.bf16.msra.mxu1 %v1228_v43 }
 0x284   : > { %v1190_v45 = vsel %vm1169_vm3, %v1034_v44, 0 }
 0x285   : > { %1199 = vmatpush.bf16.msrb.mxu3 %v1190_v45 }
 0x2c3   : > { %v1150_v46 = vpop.xlane.xlu0 %1149 }
 0x2c4   : > { %1890 = vrcp.f32 %v1150_v46 }
 0x2ca   : > { %v1891_v47 = vpop.eup %1890 }
 0x2cb   : > { %v1160_v48 = vmul.f32 %v1891_v47, %v2397_v11  ;;  %v1144_v49 = vpop.xlane.xlu2 %1143 }
 0x2cc   : > { %1892 = vrcp.f32 %v1144_v49 }
 0x2cd   : > { %v1164_v50 = vpack.c.bf16 %v1160_v48, %v1160_v48 }
 0x2cf   : > { %1728 = vmatmul.msk.bf16.vlgmr.msra.gmra.mxu0 %vm1037_vm2, %v1164_v50 }
 0x2d2   : > { %v1893_v51 = vpop.eup %1892 }
 0x2d3   : > { %v1158_v52 = vmul.f32 %v1893_v51, %v2401_v39  ;;  %v1147_v53 = vpop.xlane.xlu2 %1146 }
 0x2d4   : > { %1894 = vrcp.f32 %v1147_v53 }
 0x2d5   : > { %v1162_v54 = vpack.c.bf16 %v1158_v52, %v1158_v52 }
 0x2d7   : > { %1726 = vmatmul.msk.bf16.vlgmr.msrb.gmra.mxu2 %vm1037_vm2, %v1162_v54 }
 0x2da   : > { %v1895_v55 = vpop.eup %1894 }
 0x2db   : > { %v1159_v56 = vmul.f32 %v1895_v55, %v2405_v18  ;;  %v1153_v57 = vpop.xlane.xlu2 %1152 }
 0x2dc   : > { %1896 = vrcp.f32 %v1153_v57 }
 0x2dd   : > { %v1163_v58 = vpack.c.bf16 %v1159_v56, %v1159_v56 }
 0x2df   : > { %1727 = vmatmul.msk.bf16.vlgmr.msrb.gmra.mxu3 %vm1037_vm2, %v1163_v58 }
 0x2e2   : > { %v1897_v11 = vpop.eup %1896 }
 0x2e3   : > { %v1161_v59 = vmul.f32 %v1897_v11, %v2409_v26 }
 0x2e5   : > { %v1165_v60 = vpack.c.bf16 %v1161_v59, %v1161_v59 }
 0x2e7   : > { %1729 = vmatmul.msk.bf16.vlgmr.msra.gmra.mxu1 %vm1037_vm2, %v1165_v60 }
 0x34c   : > { %v1220_v39 = vpop.f32.mrf.mxu0 }
 0x34d   : > { %v1243_v0 = vrot.slane %v1220_v39, 4 }
 0x354   : > { %v1222_v61 = vpop.f32.mrf.mxu0 }
 0x35a   : > { %v1182_v62 = vpop.f32.mrf.mxu2 }
 0x35b   : > { %v1245_v63 = vrot.slane %v1182_v62, 4  ;;  %v1244_v18 = vsel %vm673_vm1, %v1243_v0, %v1182_v62 }
 0x35c   : > { %v1250_v7 = vperm.slane %v1244_v18, %v2289_v25 }
 0x35d   : > { %v1246_v1 = vsel %vm673_vm1, %v1220_v39, %v1245_v63 }
 0x35e   : > { %v1254_v2 = vperm.slane %v1246_v1, %v2289_v25  ;;  %v1269_v13 = vrot.slane %v1250_v7, 4 }
 0x360   : > { %v1281_v10 = vrot.slane %v1254_v2, 4 }
 0x362   : > { %v1184_v3 = vpop.f32.mrf.mxu2  ;;  %v1201_v5 = vpop.f32.mrf.mxu3 }
 0x363   : > { %v1257_v6 = vrot.slane %v1201_v5, 4  ;;  %v1774_v3 = vld [vmem:[#allocation5 + $0x8] sm:$0xff] }
 0x364   : > { %v1239_v26 = vpop.f32.mrf.mxu1  ;;  %1400 = vmatpush.bf16.msra.mxu2 %v1774_v3 }
 0x365   : > { %v1255_v8 = vrot.slane %v1239_v26, 4  ;;  %v1258_v9 = vsel %vm673_vm1, %v1239_v26, %v1257_v6 }
 0x366   : > { %v1266_v12 = vperm.slane %v1258_v9, %v2289_v25 }
 0x367   : > { %v1256_v14 = vsel %vm673_vm1, %v1255_v8, %v1201_v5  ;;  %v1773_v5 = vld [vmem:[#allocation5] sm:$0xff] }
 0x368   : > { %v1262_v21 = vperm.slane %v1256_v14, %v2289_v25  ;;  %v1279_v15 = vrot.slane %v1266_v12, 4  ;;  %v1282_v20 = vsel %vm673_vm1, %v1266_v12, %v1281_v10  ;;  %1401 = vmatpush.bf16.msra.mxu2 %v1773_v5  ;;  %v1875_v12 = vld [vmem:[%s2586_s7] ss:$0 sm:$0xff] }
 0x369   : > { %v1290_v16 = vperm.slane %v1282_v20, %v2304_v41 }
 0x36a   : > { %v1267_v17 = vrot.slane %v1262_v21, 4  ;;  %v1270_v19 = vsel %vm673_vm1, %v1262_v21, %v1269_v13  ;;  %v1280_v22 = vsel %vm673_vm1, %v1279_v15, %v1254_v2  ;;  %v1203_v23 = vpop.f32.mrf.mxu3 }
 0x36b   : > { %v1278_v24 = vperm.slane %v1270_v19, %v2304_v41  ;;  %v1286_v27 = vperm.slane %v1280_v22, %v2304_v41  ;;  %v1297_v28 = vrot.slane %v1290_v16, 4  ;;  %v2080_v16 = vmov 32.0  }
 0x36c   : > { %v1268_v29 = vsel %vm673_vm1, %v1267_v17, %v1250_v7  ;;  %v1241_v30 = vpop.f32.mrf.mxu1  ;;  %1898 = vrcp.f32 %v2080_v16 }
 0x36d   : > { %v1274_v31 = vperm.slane %v1268_v29, %v2304_v41  ;;  %v1293_v32 = vrot.slane %v1278_v24, 4  ;;  %v1295_v33 = vrot.slane %v1286_v27, 4  ;;  %v1298_v34 = vsel %vm673_vm1, 0.0, %v1297_v28 }
 0x36e   : > { %v1310_v35 = vsel %vm673_vm1, %v1297_v28, %v1286_v27  ;;  %v1315_v36 = vrot.slane %v1298_v34, 4  ;;  %v1780_v34 = vld [vmem:[%s2591_s12 + $0x18] sm:$0xff] }
 0x36f   : > { %v1291_v37 = vrot.slane %v1274_v31, 4  ;;  %v1294_v38 = vsel %vm673_vm1, 0.0, %v1293_v32  ;;  %v1296_v40 = vsel %vm673_vm1, 0.0, %v1295_v33  ;;  %v1314_v42 = vperm.slane %v1310_v35, %v2289_v25  ;;  %v1775_v33 = vld [vmem:[#allocation7] sm:$0xff]  ;;  %1530 = vmatpush.bf16.msrb.mxu0 %v1780_v34 }
 0x370   : > { %v1304_v43 = vrot.slane %v1294_v38, 4  ;;  %v1299_v44 = vsel %vm673_vm1, %v1293_v32, %v1274_v31  ;;  %v1316_v45 = vsel %vm673_vm1, %v1315_v36, %v1296_v40  ;;  %v1778_v40 = vld [vmem:[%s2591_s12 + $0x8] sm:$0xff] }
 0x371   : > { %v1292_v46 = vsel %vm673_vm1, 0.0, %v1291_v37  ;;  %v1303_v47 = vperm.slane %v1299_v44, %v2289_v25  ;;  %v1320_v48 = vperm.slane %v1316_v45, %v2289_v25  ;;  %v1335_v49 = vrot.slane %v1314_v42, 4  ;;  %v1779_v37 = vld [vmem:[%s2591_s12 + $0x10] sm:$0xff] }
 0x372   : > { %v1305_v50 = vsel %vm673_vm1, %v1304_v43, %v1292_v46  ;;  %v1899_v17 = vpop.eup %1898 }
 0x373   : > { %v1309_v51 = vperm.slane %v1305_v50, %v2289_v25  ;;  %v1323_v52 = vrot.slane %v1303_v47, 4  ;;  %v1336_v53 = vsel %vm673_vm1, %v1320_v48, %v1335_v49  ;;  %v1333_v54 = vrot.slane %v1320_v48, 4  ;;  %1531 = vmatpush.bf16.msrb.mxu0 %v1779_v37  ;;  %v1876_v48 = vld [vmem:[%s2587_s8] ss:$0 sm:$0xff] }
 0x374   : > { %v1344_v55 = vperm.slane %v1336_v53, %v2304_v41  ;;  %v1414_v19 = vmul.f32 32.0, %v1899_v17  ;;  %vm1418_vm6 = vweird.f32 %v1899_v17  ;;  %v1877_v50 = vld [vmem:[%s2588_s9] ss:$0 sm:$0xff] }
 0x375   : > { %v1324_v56 = vsel %vm673_vm1, %v1309_v51, %v1323_v52  ;;  %v1321_v57 = vrot.slane %v1309_v51, 4  ;;  %v1334_v58 = vsel %vm673_vm1, %v1333_v54, %v1314_v42 }
 0x376   : > { %v1332_v11 = vperm.slane %v1324_v56, %v2304_v41  ;;  %v1349_v59 = vrot.slane %v1344_v55, 4  ;;  %v1340_v60 = vperm.slane %v1334_v58, %v2304_v41  ;;  %v1415_v22 = vsub.f32 1.0, %v1414_v19  ;;  %v1878_v56 = vld [vmem:[%s2590_s11] ss:$0 sm:$0xff] }
 0x377   : > { %v1322_v39 = vsel %vm673_vm1, %v1321_v57, %v1303_v47  ;;  %1532 = vmatpush.bf16.msrb.mxu0 %v1778_v40 }
 0x378   : > { %v1350_v25 = vsel %vm673_vm1, %v1349_v59, %v1332_v11  ;;  %v1328_v61 = vperm.slane %v1322_v39, %v2304_v41  ;;  %v1345_v62 = vrot.slane %v1340_v60, 4  ;;  %v1351_v18 = vrot.slane %v1332_v11, 4  ;;  %v1879_v39 = vld [vmem:[%s2592_s13] ss:$0 sm:$0xff] }
 0x379   : > { %1358 = vrot.lane.b32.xlu2 %v1350_v25, %s2077_s27  ;;  %v1416_v23 = vmul.f32 %v1899_v17, %v1415_v22 }
 0x37a   : > { %v1347_v63 = vrot.slane %v1328_v61, 4  ;;  %v1346_v0 = vsel %vm673_vm1, %v1345_v62, %v1328_v61  ;;  %v1352_v2 = vsel %vm673_vm1, %v1344_v55, %v1351_v18  ;;  %v1777_v55 = vld [vmem:[%s2591_s12] sm:$0xff] }
 0x37b   : > { %v1417_v24 = vadd.f32 %v1899_v17, %v1416_v23  ;;  %1533 = vmatpush.bf16.msrb.mxu0 %v1777_v55 }
 0x37c   : > { %v1348_v1 = vsel %vm673_vm1, %v1340_v60, %v1347_v63 }
 0x37d   : > { %1354 = vrot.lane.b32.xlu1 %v1348_v1, %s2078_s30  ;;  %v1419_v27 = vsel %vm1418_vm6, %v1899_v17, %v1417_v24  ;;  %s2619_s30 = sld [smem:[#allocation21_spill]] }
 0x385   : > { %1362 = vrot.lane.b32.xlu1 %v1352_v2, %s2079_s17  ;;  %s575_s17 = scalar_lea.vmem [#allocation8], %s1701_s28  ;;  %s2014_s28 = scalar_lea.hbm %s2595_s16, 16 }
 0x386   : > { %s1586_s25 = sshll.u32 %s575_s17, 4  ;;  %p2016_p4 = scmp.lt.s32.totalorder %s2014_s28, %s2010_s29  ;;  %s1587_s25 = int_to_ptr.vmem [resolvable:$true] %s1586_s25 }
 0x388   : > { %p2017_p7 = por %p2016_p4, %p2015_p3 }
 0x38a   : > { %p2018_p8 = pnand %p2017_p7, %p2013_p2 }
 0x3d3   : > { %v1359_v7 = vpop.permute.xlu2 %1358 }
 0x3ef   : > { %v1355_v41 = vpop.permute.xlu1 %1354 }
 0x3f0   : > { %v1365_v6 = vsel %vm1037_vm2, %v1346_v0, %v1355_v41 }
 0x3f1   : > { %v1367_v8 = vsel %vm1366_vm4, %v1365_v6, %v1359_v7 }
 0x3f7   : > { %v1363_v26 = vpop.permute.xlu1 %1362 }
 0x3f8   : > { %v1369_v9 = vsel %vm1368_vm5, %v1367_v8, %v1363_v26 }
 0x3f9   : > { %v1370_v10 = vpack.c.bf16 %v1369_v9, %v1369_v9 }
 0x3fb   : > { %1738 = vmatmul.msk.bf16.vlgmr.msra.gmra.mxu2 %vm609_vm0, %v1370_v10 }
 0x47e   : > { %v1403_v14 = vpop.f32.mrf.mxu2 }
 0x47f   : > { %v1404_v13 = vadd.f32 %v1875_v12, %v1403_v14 }
 0x481   : > { %v1407_v21 = vadd.f32 %v1404_v13, %v2266_v4  ;;  %v1776_v4 = vld [vmem:[#allocation7 + $0x8] sm:$0xff]  ;;  %v1880_v13 = vld [vmem:[%s2593_s14] ss:$0 sm:$0xff] }
 0x482   : > { %1477 = vmatpush.bf16.msra.mxu3 %v1776_v4 }
 0x483   : > { %v1410_v15 = vsel %vm609_vm0, %v1407_v21, 0.0 }
 0x484   : > { %1411 = vadd.xlane.f32.xlu1 %v1410_v15 }
 0x486   : > { %v1405_v20 = vpop.f32.mrf.mxu2  ;;  %1478 = vmatpush.bf16.msra.mxu3 %v1775_v33 }
 0x487   : > { %v1881_v20 = vld [vmem:[%s2619_s30] ss:$0 sm:$0xff] }
 0x4f7   : > { %v1412_v28 = vpop.xlane.xlu1 %1411 }
 0x4f8   : > { %v1420_v29 = vmul.f32 %v1419_v27, %v1412_v28 }
 0x4fa   : > { %v1421_v30 = vsub.f32 %v1407_v21, %v1420_v29 }
 0x4fc   : > { %v1422_v31 = vmul.f32 %v1421_v30, %v1421_v30 }
 0x4fe   : > { %v1423_v32 = vsel %vm609_vm0, %v1422_v31, 0.0 }
 0x4ff   : > { %1424 = vadd.xlane.f32.xlu2 %v1423_v32 }
 0x572   : > { %v1425_v35 = vpop.xlane.xlu2 %1424 }
 0x573   : > { %v1426_v36 = vmul.f32 %v1425_v35, %v1419_v27 }
 0x575   : > { %v1427_v38 = vadd.f32 1e-05, %v1426_v36 }
 0x577   : > { %1900 = vrsqrt.f32 %v1427_v38  ;;  %vm1434_vm8 = vweird.f32 %v1427_v38 }
 0x57d   : > { %v1901_v42 = vpop.eup %1900 }
 0x57e   : > { %v1429_v43 = vmul.f32 %v1901_v42, %v1427_v38  ;;  %vm1435_vm7 = vweird.f32 %v1901_v42 }
 0x57f   : > { %vm1436_vm9 = vmor %vm1434_vm8, %vm1435_vm7 }
 0x580   : > { %v1430_v44 = vmul.f32 %v1901_v42, %v1429_v43 }
 0x582   : > { %v1431_v45 = vmul.f32 0.5, %v1430_v44 }
 0x584   : > { %v1432_v46 = vsub.f32 1.5, %v1431_v45 }
 0x586   : > { %v1433_v47 = vmul.f32 %v1901_v42, %v1432_v46 }
 0x588   : > { %v1437_v49 = vsel %vm1436_vm9, %v1901_v42, %v1433_v47 }
 0x589   : > { %v1438_v51 = vmul.f32 %v1437_v49, %v1421_v30 }
 0x58b   : > { %v1442_v52 = vmul.f32 %v1876_v48, %v1438_v51 }
 0x58d   : > { %v1446_v53 = vadd.f32 %v1877_v50, %v1442_v52 }
 0x58f   : > { %v1447_v54 = vpack.c.bf16 %v1446_v53, %v1446_v53 }
 0x591   : > { %1747 = vmatmul.msk.bf16.vlgmr.msra.gmra.mxu3 %vm609_vm0, %v1447_v54 }
 0x614   : > { %v1480_v57 = vpop.f32.mrf.mxu3 }
 0x615   : > { %v1481_v58 = vadd.f32 %v1878_v56, %v1480_v57 }
 0x617   : > { %v1484_v11 = vmax.f32 %v1481_v58, 0.0 }
 0x619   : > { %v1485_v59 = vpack.c.bf16 %v1484_v11, %v1484_v11 }
 0x61b   : > { %1764 = vmatmul.msk.bf16.vlgmr.msrb.gmra.mxu0 %vm1522_vm10, %v1485_v59 }
 0x61c   : > { %v1482_v60 = vpop.f32.mrf.mxu3 }
 0x698   : > { %v1535_v25 = vpop.f32.mrf.mxu0 }
 0x699   : > { %v1536_v61 = vadd.f32 %v1879_v39, %v1535_v25 }
 0x69b   : > { %v1539_v62 = vadd.f32 %v1536_v61, %v1446_v53 }
 0x69d   : > { %v1542_v63 = vsel %vm609_vm0, %v1539_v62, 0.0 }
 0x69e   : > { %1543 = vadd.xlane.f32.xlu0 %v1542_v63 }
 0x6a0   : > { %v1537_v0 = vpop.f32.mrf.mxu0 }
 0x711   : > { %v1544_v1 = vpop.xlane.xlu0 %1543 }
 0x712   : > { %v1545_v18 = vmul.f32 %v1544_v1, %v1419_v27 }
 0x714   : > { %v1546_v2 = vsub.f32 %v1539_v62, %v1545_v18 }
 0x716   : > { %v1547_v3 = vmul.f32 %v1546_v2, %v1546_v2 }
 0x718   : > { %v1548_v5 = vsel %vm609_vm0, %v1547_v3, 0.0 }
 0x719   : > { %1549 = vadd.xlane.f32.xlu0 %v1548_v5 }
 0x78c   : > { %v1550_v41 = vpop.xlane.xlu0 %1549 }
 0x78d   : > { %v1551_v6 = vmul.f32 %v1550_v41, %v1419_v27 }
 0x78f   : > { %v1552_v7 = vadd.f32 1e-05, %v1551_v6 }
 0x791   : > { %1902 = vrsqrt.f32 %v1552_v7  ;;  %vm1559_vm12 = vweird.f32 %v1552_v7 }
 0x797   : > { %v1903_v26 = vpop.eup %1902 }
 0x798   : > { %v1554_v8 = vmul.f32 %v1903_v26, %v1552_v7  ;;  %vm1560_vm11 = vweird.f32 %v1903_v26 }
 0x799   : > { %vm1561_vm13 = vmor %vm1559_vm12, %vm1560_vm11 }
 0x79a   : > { %v1555_v9 = vmul.f32 %v1903_v26, %v1554_v8 }
 0x79c   : > { %v1556_v10 = vmul.f32 0.5, %v1555_v9 }
 0x79e   : > { %v1557_v12 = vsub.f32 1.5, %v1556_v10 }
 0x7a0   : > { %v1558_v14 = vmul.f32 %v1903_v26, %v1557_v12 }
 0x7a2   : > { %v1562_v21 = vsel %vm1561_vm13, %v1903_v26, %v1558_v14 }
 0x7a3   : > { %v1563_v15 = vmul.f32 %v1562_v21, %v1546_v2 }
 0x7a5   : > { %v1567_v16 = vmul.f32 %v1880_v13, %v1563_v15 }
 0x7a7   : > { %v1571_v17 = vadd.f32 %v1881_v20, %v1567_v16 }
 0x7a9   : > { %1572 = vst.msk [vmem:[%s575_s17] sm:$0xff] %vm609_vm0, %v1571_v17 }
 0x7aa   : > { %2021 = shalt.err (!%p2018_p8)
}
 0x7ab   : > { %1793 = dma.vmem_to_hbm [thread:$0]  (%p2204_p5), %s1587_s25, 128, %s1589_s18, %s1574_s26  }
 0x7ac PF: > { %s2620_s20 = sld [smem:[#allocation14_spill]] }
 0x7ad   : > { %s2621_s23 = sld [smem:[#allocation12_spill]] }
 0x7b2   : > { %p1815_p9 = scmp.ge.s32.totalorder %s2620_s20, 2 }
 0x7b3   : > { %s1600_s27 = sand.u32 1, %s2621_s23  }
 0x7b4   : > { %p1806_p10 = pnand %p1815_p9, %p2208_p6  ;;  %s1601_s30 = scalar_lea.sflag [#allocation4], %s1600_s27 }
 0x7b6   : > { %p1807_p11 = pneg %p1806_p10 }
 0x7b8   : > { %2047 = dma.done.wait (%p1807_p11), %s1601_s30, 128  }
 0x7b9   : > { %2049 = vsyncadd (%p1807_p11), %s1601_s30, 4294967168  ;;  %s2623_s24 = sld [smem:[#allocation15_spill]]  ;;  %s2626_s21 = smov %s2056_s22 }
 0x7ba   : > { %s2624_s17 = sld [smem:[#allocation13_spill]] }
 0x7bb   : > { %s2625_s23 = sld [smem:[#allocation16_spill]] }
 0x7bf   : > { %p28_p12 = scmp.ge.s32.totalorder %s2623_s24, 4  }
 0x7c0   : > { %s2627_s22 = smov %s2624_s17 }
 0x7c1   :  { %30 = sbr.rel (!%p28_p12) target bundleno = 10 (0xa), region = 135 }
 0x7c6   :  { %1607 = vsyncpa [#allocation3], 1 }
 0x7c7   :  { %1609 = vsyncpa [#allocation3 + $0x1], 1 }
 0x7c8   :  { %1610 = vsyncpa [#allocation6], 1 }
 0x7c9   :  { %1611 = vsyncpa [#allocation4], 1 }
 0x7ca   :  { %1613 = vsyncpa [#allocation4 + $0x1], 1 }

</bundles_post_ra>
